<compile_context>
chip_gen: v5e
topology: v5e:2x2
jax: 0.10.0
libtpu: 0.0.40
codegen_flags: <defaults>
</compile_context>

<pallas_src>
import jax
import jax.numpy as jnp
from jax.experimental import pallas as pl
from jax.experimental.pallas import tpu as pltpu


def _make_kernel(quantiles):
    """Build the pinball-loss kernel for a static quantile list."""
    quantiles = tuple(float(q) for q in quantiles)

    def kernel(y_pred_ref, y_true_ref, partial_ref):
        # y_pred_ref: (tb, Q, T)   y_true_ref: (tb, T)   partial_ref: (1, 1, T)
        y_true = y_true_ref[...].astype(jnp.float32)                 # (tb, T)
        total = jnp.zeros_like(y_true)
        for i, q in enumerate(quantiles):                            # static unroll over Q
            err = y_true - y_pred_ref[:, i, :].astype(jnp.float32)   # (tb, T)
            # max((q-1)*e, q*e) == q*e - min(e, 0)
            total = total + (jnp.float32(q) * err
                             - jnp.minimum(err, jnp.float32(0.0)))
        # cheap sublane partial reduce; lane axis stays dense for the store.
        partial_ref[...] = total.sum(axis=0, keepdims=True)[None]    # (1, 1, T)

    return kernel


def _pick_tb(B, Q, T, itemsize, budget_bytes=8 << 20):
    """Largest multiple-of-8 divisor of B keeping the double-buffered per-step
    footprint under budget, preferring >= 4 grid steps for pipelining."""
    q_pad = ((Q + 7) // 8) * 8                 # Q pads to 8 sublanes in VMEM
    per_row = (q_pad + 1) * T * itemsize       # y_pred row (padded) + y_true row
    cap = max(8, (budget_bytes // (2 * per_row)) // 8 * 8)
    if B >= 32:                                # prefer >= 4 pipelined steps
        cap = min(cap, max(8, (B // 4) // 8 * 8))
    best = None
    for cand in range(8, min(B, cap) + 1, 8):
        if B % cand == 0:
            best = cand
    return best if best is not None else B     # fallback: single full block


def multi_quantile_loss(y_pred, y_true, quantiles, *, tb=None):
    """y_pred: (B, Q, T) float, y_true: (B, T) float -> scalar float32 loss."""
    B, Q, T = y_pred.shape
    assert y_true.shape == (B, T)
    if tb is None:
        tb = _pick_tb(B, Q, T, jnp.dtype(y_pred.dtype).itemsize)
    assert B % tb == 0, "batch tile must divide batch"
    num_tiles = B // tb

    kernel = _make_kernel(quantiles)

    partials = pl.pallas_call(
        kernel,
        out_shape=jax.ShapeDtypeStruct((num_tiles, 1, T), jnp.float32),
        grid_spec=pltpu.PrefetchScalarGridSpec(
            num_scalar_prefetch=0,
            grid=(num_tiles,),
            in_specs=[
                pl.BlockSpec((tb, Q, T), lambda i: (i, 0, 0)),   # native (B,Q,T) layout
                pl.BlockSpec((tb, T), lambda i: (i, 0)),         # matching y_true tile
            ],
            out_specs=pl.BlockSpec((1, 1, T), lambda i: (i, 0, 0)),  # per-tile partial
        ),
        compiler_params=pltpu.CompilerParams(
            dimension_semantics=("parallel",),      # independent tiles -> both TCs on v7x
            vmem_limit_bytes=32 * 1024 * 1024,      # explicit budget, safe on v5e/v6e/v7x
        ),
    )(y_pred, y_true)

    # tiny final reduction in plain JAX: sum of partials / (B*T) == mean over
    # batch*time of the per-element quantile-summed loss.
    return jnp.sum(partials) / jnp.float32(B * T)


if __name__ == "__main__":
    # small, tile-friendly shapes consistent with the module's forward:
    #   y_pred: (B, Q, T), y_true: (B, T)
    B, Q, T = 32, 3, 128
    quantiles = [0.1, 0.5, 0.9]

    key = jax.random.PRNGKey(0)
    k1, k2 = jax.random.split(key)
    y_pred = jax.random.normal(k1, (B, Q, T), dtype=jnp.float32)
    y_true = jax.random.normal(k2, (B, T), dtype=jnp.float32)

    loss = multi_quantile_loss(y_pred, y_true, quantiles)
    loss = jax.block_until_ready(loss)

    # pure-JAX reference for a sanity check
    errs = y_true[:, None, :] - y_pred                              # (B, Q, T)
    qarr = jnp.asarray(quantiles, jnp.float32)[None, :, None]
    ref = jnp.mean(jnp.sum(jnp.maximum((qarr - 1.0) * errs, qarr * errs), axis=1))
    assert abs(float(loss) - float(ref)) < 1e-4, (float(loss), float(ref))

    print("KERNEL_OK")
</pallas_src>

<mosaic_0001>
module attributes {stable_mosaic.version = 11 : i64} {
  func.func @kernel(%arg0: i32, %arg1: memref<8x3x128xf32, #tpu.memory_space<vmem>>, %arg2: memref<8x128xf32, #tpu.memory_space<vmem>>, %arg3: memref<1x1x128xf32, #tpu.memory_space<vmem>>) attributes {dimension_semantics = [#tpu.dimension_semantics<parallel>], iteration_bounds = array<i64: 4>, scalar_prefetch = 0 : i64, scratch_operands = 0 : i64, tpu.core_type = #tpu.core_type<tc>, window_params = [{transform_indices = @transform_0, window_bounds = array<i64: 8, 3, 128>}, {transform_indices = @transform_1, window_bounds = array<i64: 8, 128>}, {transform_indices = @transform_2, window_bounds = array<i64: 1, 1, 128>}]} {
    %c0 = arith.constant 0 : index
    %c0_0 = arith.constant 0 : index
    %0 = vector.load %arg2[%c0, %c0_0] : memref<8x128xf32, #tpu.memory_space<vmem>>, vector<8x128xf32>
    %cst = arith.constant 0.000000e+00 : f32
    %1 = vector.broadcast %cst : f32 to vector<8x128xf32>
    %c0_1 = arith.constant 0 : index
    %c0_2 = arith.constant 0 : index
    %c0_3 = arith.constant 0 : index
    %2 = vector.load %arg1[%c0_1, %c0_2, %c0_3] : memref<8x3x128xf32, #tpu.memory_space<vmem>>, vector<8x1x128xf32>
    %3 = vector.shape_cast %2 : vector<8x1x128xf32> to vector<8x128xf32>
    %4 = arith.subf %0, %3 : vector<8x128xf32>
    %cst_4 = arith.constant 1.000000e-01 : f32
    %5 = vector.broadcast %cst_4 : f32 to vector<8x128xf32>
    %6 = arith.mulf %5, %4 : vector<8x128xf32>
    %cst_5 = arith.constant 0.000000e+00 : f32
    %7 = vector.broadcast %cst_5 : f32 to vector<8x128xf32>
    %8 = arith.minimumf %4, %7 : vector<8x128xf32>
    %9 = arith.subf %6, %8 : vector<8x128xf32>
    %10 = arith.addf %1, %9 : vector<8x128xf32>
    %c0_6 = arith.constant 0 : index
    %c1 = arith.constant 1 : index
    %c0_7 = arith.constant 0 : index
    %11 = vector.load %arg1[%c0_6, %c1, %c0_7] : memref<8x3x128xf32, #tpu.memory_space<vmem>>, vector<8x1x128xf32>
    %12 = vector.shape_cast %11 : vector<8x1x128xf32> to vector<8x128xf32>
    %13 = arith.subf %0, %12 : vector<8x128xf32>
    %cst_8 = arith.constant 5.000000e-01 : f32
    %14 = vector.broadcast %cst_8 : f32 to vector<8x128xf32>
    %15 = arith.mulf %14, %13 : vector<8x128xf32>
    %cst_9 = arith.constant 0.000000e+00 : f32
    %16 = vector.broadcast %cst_9 : f32 to vector<8x128xf32>
    %17 = arith.minimumf %13, %16 : vector<8x128xf32>
    %18 = arith.subf %15, %17 : vector<8x128xf32>
    %19 = arith.addf %10, %18 : vector<8x128xf32>
    %c0_10 = arith.constant 0 : index
    %c2 = arith.constant 2 : index
    %c0_11 = arith.constant 0 : index
    %20 = vector.load %arg1[%c0_10, %c2, %c0_11] : memref<8x3x128xf32, #tpu.memory_space<vmem>>, vector<8x1x128xf32>
    %21 = vector.shape_cast %20 : vector<8x1x128xf32> to vector<8x128xf32>
    %22 = arith.subf %0, %21 : vector<8x128xf32>
    %cst_12 = arith.constant 0.899999976 : f32
    %23 = vector.broadcast %cst_12 : f32 to vector<8x128xf32>
    %24 = arith.mulf %23, %22 : vector<8x128xf32>
    %cst_13 = arith.constant 0.000000e+00 : f32
    %25 = vector.broadcast %cst_13 : f32 to vector<8x128xf32>
    %26 = arith.minimumf %22, %25 : vector<8x128xf32>
    %27 = arith.subf %24, %26 : vector<8x128xf32>
    %28 = arith.addf %19, %27 : vector<8x128xf32>
    %cst_14 = arith.constant dense<0.000000e+00> : vector<128xf32>
    %29 = vector.multi_reduction <add>, %28, %cst_14 [0] : vector<8x128xf32> to vector<128xf32>
    %30 = vector.shape_cast %29 : vector<128xf32> to vector<1x128xf32>
    %31 = vector.shape_cast %30 : vector<1x128xf32> to vector<1x1x128xf32>
    %c0_15 = arith.constant 0 : index
    %c0_16 = arith.constant 0 : index
    %c0_17 = arith.constant 0 : index
    %32 = vector.load %arg3[%c0_15, %c0_16, %c0_17] : memref<1x1x128xf32, #tpu.memory_space<vmem>>, vector<1x1x128xf32>
    tpu.vector_store %arg3[%c0_15, %c0_16, %c0_17], %31 {strides = array<i32>} : memref<1x1x128xf32, #tpu.memory_space<vmem>>, vector<1x1x128xf32>,
    return
  }
  func.func @transform_0(%arg0: i32) -> (i32, i32, i32) {
    %c0_i32 = arith.constant 0 : i32
    %c0_i32_0 = arith.constant 0 : i32
    %c0_i32_1 = arith.constant 0 : i32
    return %arg0, %c0_i32, %c0_i32_0 : i32, i32, i32
  }
  func.func @transform_1(%arg0: i32) -> (i32, i32) {
    %c0_i32 = arith.constant 0 : i32
    %c0_i32_0 = arith.constant 0 : i32
    return %arg0, %c0_i32 : i32, i32
  }
  func.func @transform_2(%arg0: i32) -> (i32, i32, i32) {
    %c0_i32 = arith.constant 0 : i32
    %c0_i32_0 = arith.constant 0 : i32
    %c0_i32_1 = arith.constant 0 : i32
    return %arg0, %c0_i32, %c0_i32_0 : i32, i32, i32
  }
}

</mosaic_0001>

<bundles_post_ra>
// kernel: tpu_custom_call.1
= control target key start
LH: loop header
LB: loop body
LE: loop exit
PB: predicated region body
PF: predicated region fallthrough
CT: control target
= control target key end

     0   :  { %7 = vsyncpa [#allocation3], 0  ;;  %s626_s0 = inlined_call_operand.vmem [shape: f32[32,3,128], index: 0, kind: input, shape index: {}]   ;;  %s627_s1 = inlined_call_operand.vmem [shape: f32[32,128], index: 1, kind: input, shape index: {}]   ;;  %s628_s2 = inlined_call_operand.hbm [shape: f32[4,1,128], index: 2, kind: output, shape index: {}]  }
   0x1   :  { %9 = vsyncpa [#allocation3 + $0x1], 0  ;;  %s490_s9 = smov 0   ;;  %s492_s10 = smov 0  }
   0x2   :  { %s494_s11 = smov 0   ;;  %s496_s12 = smov 0  }
   0x3 LB: > { %s511_s13 = sadd.s32 4294967295, %s473_s12   ;;  %s363_s14 = sadd.s32 4294967294, %s473_s12   ;;  %s473_s12 = sphi %s496_s12, %s634_s12   ;;  %s469_s11 = sphi %s494_s11, %s633_s11   ;;  %s465_s10 = sphi %s492_s10, %s632_s10   ;;  %s461_s9 = sphi %s490_s9, %s631_s9  }
   0x4   : > { %s515_s15 = sadd.s32 1, %s473_s12   ;;  %s74_s16 = sadd.s32 1, %s469_s11 }
   0x5   : > { %s71_s17 = ssub.s32 %s473_s12, %s515_s15  ;;  %p84_p0 = scmp.ne.s32.totalorder %s469_s11, %s465_s10 }
   0x6   : > { %p72_p1 = scmp.eq.s32.totalorder %s71_s17, 0  ;;  %p85_p2 = scmp.eq.s32.totalorder %s511_s13, 3 }
   0x7   : > { %p90_p3 = scmp.ne.s32.totalorder %s465_s10, %s461_s9  ;;  %p91_p4 = scmp.eq.s32.totalorder %s363_s14, 3 }
   0x8   : > { %s526_s18 = scalar_select %p72_p1, %s469_s11, %s74_s16  }
   0x9   : > { %p528_p5 = por %p85_p2, %p84_p0  ;;  %p532_p6 = por %p91_p4, %p90_p3 }
   0xa   : > { %p366_p7 = scmp.ge.s32.totalorder %s473_s12, 1  ;;  %p125_p8 = scmp.lt.s32.totalorder %s473_s12, 5 }
   0xc   : > { %p126_p9 = pnand %p366_p7, %p125_p8 }
   0xd   : > { %s367_s21 = sshll.u32 (!%p126_p9), %s511_s13, 3  ;;  %p156_p11 = scmp.lt.s32.totalorder (!%p126_p9), %s511_s13, 3 }
   0xe   : > { %129 = sbr.rel (%p126_p9) target bundleno = 65 (0x41), region = 28  ;;  %p151_p10 = scmp.lt.s32.totalorder (!%p126_p9), %s367_s21, 31 }
   0xf   : > { %s148_s3 = sand.u32 (!%p126_p9), 1, %s465_s10   ;;  %s292_s6 = scalar_lea.hbm (!%p126_p9), %s628_s2, %s511_s13 }
  0x10   : > { %s149_s7 = scalar_lea.vmem (!%p126_p9), [#allocation2], %s148_s3  ;;  %s296_s14 = sshll.u32 (!%p126_p9), %s292_s6, 4  ;;  %s297_s14 = int_to_ptr.hbm [resolvable:$true] %s296_s14 }
  0x11   : > { %s294_s8 = sshll.u32 (!%p126_p9), %s149_s7, 4  ;;  %s284_s16 = scalar_lea.sflag (!%p126_p9), [#allocation3], %s148_s3  ;;  %s295_s8 = int_to_ptr.vmem [resolvable:$true] %s294_s8 }
  0x12   : > { %s425_s17 = sshra.s32 (!%p126_p9), %s297_s14, 4  ;;  %s426_s17 = int_to_ptr.hbm [resolvable:$true] %s425_s17 }
  0x13   : > { %s636_s21 = smov (!%p151_p10, %s367_s21), 31  ;;  %vm178_vm0 = vcmask 1041409   ;;  %vm181_vm1 = vcmask 1042434   ;;  %vm184_vm2 = vcmask 1043459   ;;  %vm187_vm3 = vcmask 1044484   ;;  %p432_p1 = scmp.lt.s32.totalorder %s426_s17, %s628_s2 }
  0x14   : > { %s157_s22 = scalar_select %p156_p11, %s511_s13, 3  ;;  %vm190_vm4 = vcmask 1045509   ;;  %vm193_vm5 = vcmask 1046534   ;;  %vm196_vm6 = vcmask 1047559  }
  0x15   : > { %s368_s23 = sshll.u32 %s636_s21, 2  ;;  %s427_s21 = scalar_lea.hbm %s426_s17, 1 }
  0x16   : > { %s544_s26 = scalar_lea.vmem %s626_s0, %s368_s23  ;;  %s369_s27 = sshll.u32 %s157_s22, 3 }
  0x17   : > { %v161_v0 = vld [vmem:[%s544_s26] sm:$0x1]  ;;  %v162_v1 = vld [vmem:[%s544_s26 + $0x4] sm:$0x1]  ;;  %v163_v2 = vld [vmem:[%s544_s26 + $0x8] sm:$0x1]  ;;  %s159_s30 = scalar_lea.vmem %s627_s1, %s369_s27  ;;  %p428_p12 = scmp.ne.s32.totalorder %s426_s17, %s427_s21 }
  0x18   : > { %v164_v3 = vld [vmem:[%s544_s26 + $0xc] sm:$0x1]  ;;  %v165_v4 = vld [vmem:[%s544_s26 + $0x10] sm:$0x1]  ;;  %v177_v5 = vrot.slane %v162_v1, 7  ;;  %v180_v10 = vrot.slane %v163_v2, 6 }
  0x19   : > { %v166_v6 = vld [vmem:[%s544_s26 + $0x14] sm:$0x1]  ;;  %v167_v7 = vld [vmem:[%s544_s26 + $0x18] sm:$0x1]  ;;  %v168_v8 = vld [vmem:[%s544_s26 + $0x1c] sm:$0x1]  ;;  %p429_p13 = pnand %p428_p12, %p528_p5 }
  0x1a   : > { %v179_v9 = vsel %vm178_vm0, %v177_v5, %v161_v0  ;;  %v183_v11 = vrot.slane %v164_v3, 5  ;;  %v186_v12 = vrot.slane %v165_v4, 4  ;;  %v189_v13 = vrot.slane %v166_v6, 3  ;;  %v204_v15 = vld [vmem:[%s544_s26 + $0x1] sm:$0x1]  ;;  %s431_s13 = scalar_lea.hbm %s628_s2, 4 }
  0x1b   : > { %v192_v14 = vrot.slane %v167_v7, 2  ;;  %v205_v16 = vld [vmem:[%s544_s26 + $0x5] sm:$0x1]  ;;  %v182_v17 = vsel %vm181_vm1, %v180_v10, %v179_v9  ;;  %v206_v18 = vld [vmem:[%s544_s26 + $0x9] sm:$0x1]  ;;  %v195_v22 = vrot.slane %v168_v8, 1  ;;  %p430_p0 = pneg %p429_p13  ;;  %p433_p2 = scmp.lt.s32.totalorder %s431_s13, %s427_s21 }
  0x1c   : > { %v207_v19 = vld [vmem:[%s544_s26 + $0xd] sm:$0x1]  ;;  %v208_v20 = vld [vmem:[%s544_s26 + $0x11] sm:$0x1]  ;;  %v185_v21 = vsel %vm184_vm2, %v183_v11, %v182_v17  ;;  %v209_v23 = vld [vmem:[%s544_s26 + $0x15] sm:$0x1] }
  0x1d   : > { %v210_v24 = vld [vmem:[%s544_s26 + $0x19] sm:$0x1]  ;;  %v188_v25 = vsel %vm187_vm3, %v186_v12, %v185_v21  ;;  %v211_v26 = vld [vmem:[%s544_s26 + $0x1d] sm:$0x1]  ;;  %v220_v27 = vrot.slane %v205_v16, 7  ;;  %v222_v28 = vrot.slane %v206_v18, 6  ;;  %p434_p3 = por %p433_p2, %p432_p1 }
  0x1e   : > { %v224_v29 = vrot.slane %v207_v19, 5  ;;  %v160_v30 = vld [vmem:[%s159_s30] sm:$0xff]  ;;  %v191_v31 = vsel %vm190_vm4, %v189_v13, %v188_v25  ;;  %v226_v32 = vrot.slane %v208_v20, 4  ;;  %v228_v37 = vrot.slane %v209_v23, 3  ;;  %v242_v38 = vld [vmem:[%s544_s26 + $0xa] sm:$0x1] }
  0x1f   : > { %v240_v33 = vld [vmem:[%s544_s26 + $0x2] sm:$0x1]  ;;  %v241_v34 = vld [vmem:[%s544_s26 + $0x6] sm:$0x1]  ;;  %v194_v35 = vsel %vm193_vm5, %v192_v14, %v191_v31  ;;  %v221_v36 = vsel %vm178_vm0, %v220_v27, %v204_v15  ;;  %v243_v39 = vld [vmem:[%s544_s26 + $0xe] sm:$0x1]  ;;  %p435_p4 = pnand %p434_p3, %p430_p0 }
  0x20   : > { %v256_v40 = vrot.slane %v241_v34, 7  ;;  %v197_v41 = vsel %vm196_vm6, %v195_v22, %v194_v35  ;;  %v223_v42 = vsel %vm181_vm1, %v222_v28, %v221_v36  ;;  %v230_v43 = vrot.slane %v210_v24, 2  ;;  %v244_v45 = vld [vmem:[%s544_s26 + $0x12] sm:$0x1]  ;;  %v245_v46 = vld [vmem:[%s544_s26 + $0x16] sm:$0x1] }
  0x21   : > { %v232_v44 = vrot.slane %v211_v26, 1  ;;  %v199_v47 = vsub.f32 %v160_v30, %v197_v41  ;;  %v225_v48 = vsel %vm184_vm2, %v224_v29, %v223_v42  ;;  %v246_v49 = vld [vmem:[%s544_s26 + $0x1a] sm:$0x1]  ;;  %v247_v50 = vld [vmem:[%s544_s26 + $0x1e] sm:$0x1]  ;;  %v258_v52 = vrot.slane %v242_v38, 6 }
  0x22   : > { %v257_v51 = vsel %vm178_vm0, %v256_v40, %v240_v33  ;;  %v227_v53 = vsel %vm187_vm3, %v226_v32, %v225_v48  ;;  %v260_v54 = vrot.slane %v243_v39, 5  ;;  %v262_v55 = vrot.slane %v244_v45, 4 }
  0x23   : > { %v264_v56 = vrot.slane %v245_v46, 3  ;;  %v200_v57 = vmul.f32 0.1, %v199_v47  ;;  %v201_v58 = vmin.f32 %v199_v47, 0.0  ;;  %v229_v59 = vsel %vm190_vm4, %v228_v37, %v227_v53 }
  0x24   : > { %v259_v60 = vsel %vm181_vm1, %v258_v52, %v257_v51  ;;  %v231_v61 = vsel %vm193_vm5, %v230_v43, %v229_v59  ;;  %v266_v63 = vrot.slane %v246_v49, 2  ;;  %v268_v0 = vrot.slane %v247_v50, 1 }
  0x25   : > { %v261_v62 = vsel %vm184_vm2, %v260_v54, %v259_v60  ;;  %v233_v1 = vsel %vm196_vm6, %v232_v44, %v231_v61  ;;  %v202_v6 = vsub.f32 %v200_v57, %v201_v58 }
  0x26   : > { %v263_v2 = vsel %vm187_vm3, %v262_v55, %v261_v62  ;;  %v235_v3 = vsub.f32 %v160_v30, %v233_v1 }
  0x27   : > { %v265_v4 = vsel %vm190_vm4, %v264_v56, %v263_v2 }
  0x28   : > { %v267_v5 = vsel %vm193_vm5, %v266_v63, %v265_v4  ;;  %v236_v7 = vmul.f32 0.5, %v235_v3  ;;  %v237_v8 = vmin.f32 %v235_v3, 0.0 }
  0x29   : > { %v269_v9 = vsel %vm196_vm6, %v268_v0, %v267_v5 }
  0x2a   : > { %v271_v10 = vsub.f32 %v160_v30, %v269_v9  ;;  %v238_v11 = vsub.f32 %v236_v7, %v237_v8 }
  0x2c   : > { %v272_v12 = vmul.f32 0.9, %v271_v10  ;;  %v273_v13 = vmin.f32 %v271_v10, 0.0  ;;  %v239_v14 = vadd.f32 %v238_v11, %v202_v6 }
  0x2e   : > { %v274_v15 = vsub.f32 %v272_v12, %v273_v13 }
  0x30   : > { %v275_v16 = vadd.f32 %v274_v15, %v239_v14 }
  0x32   : > { %v276_v17 = vrot.slane %v275_v16, 4 }
  0x34   : > { %v277_v18 = vadd.f32 %v276_v17, %v275_v16 }
  0x36   : > { %v278_v19 = vrot.slane %v277_v18, 2 }
  0x38   : > { %v279_v20 = vadd.f32 %v278_v19, %v277_v18 }
  0x3a   : > { %v280_v21 = vrot.slane %v279_v20, 1 }
  0x3c   : > { %v281_v22 = vadd.f32 %v280_v21, %v279_v20 }
  0x3e   : > { %282 = vst [vmem:[%s149_s7] sm:$0x1] %v281_v22 }
  0x3f   : > { %438 = shalt.err (!%p435_p4)
}
  0x40   : > { %372 = dma.vmem_to_hbm [thread:$0]  (%p528_p5), %s295_s8, 16, %s297_s14, %s284_s16  }
  0x41 PF: > { %p378_p7 = scmp.ge.s32.totalorder %s473_s12, 2  ;;  %s308_s26 = sand.u32 1, %s461_s9  }
  0x42   : > { %s309_s27 = scalar_lea.sflag [#allocation3], %s308_s26 }
  0x43   : > { %p375_p8 = pnand %p378_p7, %p532_p6 }
  0x45   : > { %p376_p9 = pneg %p375_p8 }
  0x47   : > { %456 = dma.done.wait (%p376_p9), %s309_s27, 16  }
  0x48   : > { %458 = vsyncadd (%p376_p9), %s309_s27, 4294967280  ;;  %p12_p10 = scmp.ge.s32.totalorder %s515_s15, 6   ;;  %s631_s9 = smov %s465_s10 }
  0x49   : > { %s632_s10 = smov %s469_s11  ;;  %s633_s11 = smov %s526_s18 }
  0x4a   : > { %s634_s12 = smov %s515_s15  ;;  %14 = sbr.rel (!%p12_p10) target bundleno = 3 (0x3), region = 66 }
  0x4f   :  { %314 = vsyncpa [#allocation3], 1 }
  0x50   :  { %316 = vsyncpa [#allocation3 + $0x1], 1 }

</bundles_post_ra>
